<compile_context>
chip_gen: v7x
topology: tpu7x:2x2x1
jax: 0.10.0
libtpu: 0.0.40
codegen_flags: <defaults>
</compile_context>

<pallas_src>
import math
import jax
import jax.numpy as jnp
from jax.experimental import pallas as pl
from jax.experimental.pallas import tpu as pltpu


def _round_up(x, m):
    return ((x + m - 1) // m) * m


def _cdiv(a, b):
    return (a + b - 1) // b


# ------------------------------ fused kernel --------------------------------

def _make_fused_mlp_kernel(modes):
    """Kernel computing the whole MLP on one channels-first (C, tm) row tile.

    Ref order: (xz_ref, *param_refs, o_ref); per layer the params are
        mode "x"     -> (w_ext,  b)   first layer, acts on the concatenated xz operand
        mode "skip"  -> (wy, wz_ext, b)
        mode "plain" -> (w, b)
    Weights are bf16 (MXU-native); biases (dout, 1) f32; activations carried in f32 and
    cast to bf16 only as matmul operands (f32 accumulation via preferred_element_type).
    """

    def kernel(*refs):
        xz_ref = refs[0]
        o_ref = refs[-1]
        p = refs[1:-1]

        xz = xz_ref[...]                      # (Cpad, tm) bf16, lane-dense
        y = None
        idx = 0
        for mode in modes:
            if mode == "x":
                w_ref, b_ref = p[idx], p[idx + 1]
                idx += 2
                acc = jnp.dot(w_ref[...], xz, preferred_element_type=jnp.float32)
            elif mode == "skip":
                wy_ref, wz_ref, b_ref = p[idx], p[idx + 1], p[idx + 2]
                idx += 3
                # Single f32 accumulator: cat(y, z) @ W^T == Wy @ y + Wz_ext @ xz.
                acc = jnp.dot(wy_ref[...], y.astype(jnp.bfloat16),
                              preferred_element_type=jnp.float32)
                acc = acc + jnp.dot(wz_ref[...], xz,
                                    preferred_element_type=jnp.float32)
            else:
                w_ref, b_ref = p[idx], p[idx + 1]
                idx += 2
                acc = jnp.dot(w_ref[...], y.astype(jnp.bfloat16),
                              preferred_element_type=jnp.float32)
            # bias (dout, 1) broadcasts across lanes; ReLU on the VPU, stays f32.
            y = jnp.maximum(acc + b_ref[...], 0.0)
        o_ref[...] = y.astype(o_ref.dtype)

    return kernel


# ------------------------------ init helpers --------------------------------

def _xavier_uniform(key, shape, dtype=jnp.float32):
    fan_out, fan_in = shape
    a = math.sqrt(6.0 / (fan_in + fan_out))
    return jax.random.uniform(key, shape, dtype, minval=-a, maxval=a)


def _default_bias(key, fan_in, fan_out, dtype=jnp.float32):
    # PyTorch nn.Linear default bias init: U(-1/sqrt(fan_in), 1/sqrt(fan_in))
    bound = 1.0 / math.sqrt(fan_in)
    return jax.random.uniform(key, (fan_out,), dtype, minval=-bound, maxval=bound)


# --------------------------- module equivalent -------------------------------

class MLPWithInputSkips:
    """JAX/Pallas equivalent of the PyTorch MLPWithInputSkips module."""

    def __init__(self, n_layers, input_dim, output_dim, skip_dim, hidden_dim,
                 input_skips=(), *, key, tm=2048):
        self._input_skips = set(input_skips)
        # Mirrors the PyTorch module's implicit shape constraint (layer 0 always
        # consumes input_dim, so it cannot also be a skip layer).
        assert 0 not in self._input_skips, "layer 0 cannot be a skip layer"

        self.n_layers = n_layers
        self.input_dim = input_dim
        self.skip_dim = skip_dim
        self.hidden_dim = hidden_dim
        self._tm_max = tm

        # Concatenated-input channel count, padded to a multiple of 16 so the bf16
        # (Cpad, tm) block packs cleanly into sublanes with no masked rows.
        self._cat_dim = input_dim + skip_dim
        self._cpad = _round_up(self._cat_dim, 16)

        keys = jax.random.split(key, 2 * n_layers)
        self._raw_params = []    # (w, b) per layer, PyTorch layout — used by reference()
        self._flat_params = []   # kernel-ready arrays, in call order
        self._modes = []

        for layeri in range(n_layers):
            if layeri == 0:
                dimin, dimout = input_dim, hidden_dim
            elif layeri in self._input_skips:
                dimin, dimout = hidden_dim + skip_dim, hidden_dim
            else:
                dimin, dimout = hidden_dim, hidden_dim
            w = _xavier_uniform(keys[2 * layeri], (dimout, dimin))
            b = _default_bias(keys[2 * layeri + 1], dimin, dimout)
            self._raw_params.append((w, b))

            b2 = b.reshape(dimout, 1)                      # pre-reshaped once (hoisted)
            if layeri == 0:
                # Zero-extend to act directly on the concatenated xz operand.
                w_ext = jnp.zeros((dimout, self._cpad), jnp.float32)
                w_ext = w_ext.at[:, :input_dim].set(w)
                self._flat_params.extend([w_ext.astype(jnp.bfloat16), b2])
                self._modes.append("x")
            elif layeri in self._input_skips:
                wy = w[:, :hidden_dim]
                wz = w[:, hidden_dim:]
                wz_ext = jnp.zeros((dimout, self._cpad), jnp.float32)
                wz_ext = wz_ext.at[:, input_dim:input_dim + skip_dim].set(wz)
                self._flat_params.extend([wy.astype(jnp.bfloat16),
                                          wz_ext.astype(jnp.bfloat16), b2])
                self._modes.append("skip")
            else:
                self._flat_params.extend([w.astype(jnp.bfloat16), b2])
                self._modes.append("plain")

        self._kernel = _make_fused_mlp_kernel(tuple(self._modes))

    # ------------------------------ forward ---------------------------------

    def __call__(self, x, z):
        # x: (..., input_dim), z: (..., skip_dim)  -> (..., hidden_dim)
        lead = x.shape[:-1]
        n = 1
        for d in lead:
            n *= d

        xf = x.reshape(n, self.input_dim)
        zf = z.reshape(n, self.skip_dim)
        # One fused concat + cast + transpose pass -> channels-first (cat_dim, N),
        # lane-dense rows, bf16 operand (halves input HBM traffic, MXU-native).
        xz = jnp.transpose(jnp.concatenate([xf, zf], axis=-1).astype(jnp.bfloat16))

        # Bounded-waste tiling: pad N only to a multiple of 128, then split into g equal
        # lane tiles (g >= 2 when possible so both v7x TensorCores get work).
        n128 = _round_up(max(n, 1), 128)
        g = _cdiv(n128, self._tm_max)
        if g == 1 and n128 >= 256:
            g = 2
        tm = _cdiv(n128 // 128, g) * 128
        g = _cdiv(n128, tm)
        n_pad = g * tm

        xz = jnp.pad(xz, ((0, self._cpad - self._cat_dim), (0, n_pad - n)))

        in_specs = [pl.BlockSpec((self._cpad, tm), lambda i: (0, i))]
        # Weights & biases: full blocks, constant index_map -> resident in VMEM.
        for p in self._flat_params:
            in_specs.append(pl.BlockSpec(p.shape, lambda i: (0, 0)))
        out_spec = pl.BlockSpec((self.hidden_dim, tm), lambda i: (0, i))

        out2 = pl.pallas_call(
            self._kernel,
            out_shape=jax.ShapeDtypeStruct((self.hidden_dim, n_pad), x.dtype),
            grid_spec=pltpu.PrefetchScalarGridSpec(
                num_scalar_prefetch=0,
                grid=(g,),
                in_specs=in_specs,
                out_specs=out_spec,
            ),
            compiler_params=pltpu.CompilerParams(
                dimension_semantics=("parallel",),        # row tiles shard across TCs
                vmem_limit_bytes=32 * 1024 * 1024,        # explicit headroom (v5e 16MiB default)
            ),
        )(xz, *self._flat_params)

        y = jnp.transpose(out2[:, :n])                    # (N, hidden)
        return y.reshape(*lead, self.hidden_dim)

    # ------------------------------ references -------------------------------

    def reference(self, x, z):
        """Pure-JAX f32 reference mirroring the PyTorch forward."""
        lead = x.shape[:-1]
        y = x.reshape(-1, x.shape[-1]).astype(jnp.float32)
        zf = z.reshape(-1, z.shape[-1]).astype(jnp.float32)
        for li, (w, b) in enumerate(self._raw_params):
            if li in self._input_skips:
                y = jnp.concatenate([y, zf], axis=-1)
            y = jax.nn.relu(y @ w.T + b)
        return y.reshape(*lead, y.shape[-1])

    def reference_bf16_ops(self, x, z):
        """Reference with the kernel's mixed precision: bf16 matmul operands, f32 accum."""
        lead = x.shape[:-1]
        y = x.reshape(-1, x.shape[-1]).astype(jnp.float32)
        zf = z.reshape(-1, z.shape[-1]).astype(jnp.float32)
        for li, (w, b) in enumerate(self._raw_params):
            if li in self._input_skips:
                y = jnp.concatenate([y, zf], axis=-1)
            acc = jnp.dot(y.astype(jnp.bfloat16), w.T.astype(jnp.bfloat16),
                          preferred_element_type=jnp.float32)
            y = jax.nn.relu(acc + b)
        return y.reshape(*lead, y.shape[-1])


# --------------------------------- main --------------------------------------

if __name__ == "__main__":
    key = jax.random.PRNGKey(0)
    kp, kx, kz = jax.random.split(key, 3)

    n_layers = 4
    input_dim = 12
    skip_dim = 12
    hidden_dim = 32
    output_dim = 32  # note: unused by layer construction, as in the PyTorch module
    input_skips = (2,)

    mlp = MLPWithInputSkips(n_layers, input_dim, output_dim, skip_dim,
                            hidden_dim, input_skips, key=kp)

    # small input: batch=2, seq=8 leading dims, channels last
    x = jax.random.normal(kx, (2, 8, input_dim), dtype=jnp.float32)
    z = jax.random.normal(kz, (2, 8, skip_dim), dtype=jnp.float32)

    out = jax.block_until_ready(mlp(x, z))

    ref_bf16 = jax.block_until_ready(mlp.reference_bf16_ops(x, z))
    ref_f32 = jax.block_until_ready(mlp.reference(x, z))

    assert out.shape == (2, 8, hidden_dim)
    # Tight check vs. a reference with the kernel's exact mixed-precision numerics.
    assert jnp.allclose(out, ref_bf16, rtol=1e-3, atol=1e-3)
    # Loose check vs. full-f32 module semantics (bf16 operand rounding only).
    assert jnp.allclose(out, ref_f32, rtol=3e-2, atol=3e-2)

    print("KERNEL_OK")
</pallas_src>

<mosaic_0001>
module attributes {stable_mosaic.version = 11 : i64} {
  func.func @kernel(%arg0: i32, %arg1: memref<32x128xbf16, #tpu.memory_space<vmem>>, %arg2: memref<32x32xbf16, #tpu.memory_space<vmem>>, %arg3: memref<32x1xf32, #tpu.memory_space<vmem>>, %arg4: memref<32x32xbf16, #tpu.memory_space<vmem>>, %arg5: memref<32x1xf32, #tpu.memory_space<vmem>>, %arg6: memref<32x32xbf16, #tpu.memory_space<vmem>>, %arg7: memref<32x32xbf16, #tpu.memory_space<vmem>>, %arg8: memref<32x1xf32, #tpu.memory_space<vmem>>, %arg9: memref<32x32xbf16, #tpu.memory_space<vmem>>, %arg10: memref<32x1xf32, #tpu.memory_space<vmem>>, %arg11: memref<32x128xf32, #tpu.memory_space<vmem>>) attributes {dimension_semantics = [#tpu.dimension_semantics<parallel>], iteration_bounds = array<i64: 1>, scalar_prefetch = 0 : i64, scratch_operands = 0 : i64, tpu.core_type = #tpu.core_type<tc>, window_params = [{transform_indices = @transform_0, window_bounds = array<i64: 32, 128>}, {pipeline_mode = #tpu.pipeline_mode<synchronous>, transform_indices = @transform_1, window_bounds = array<i64: 32, 32>}, {pipeline_mode = #tpu.pipeline_mode<synchronous>, transform_indices = @transform_2, window_bounds = array<i64: 32, 1>}, {pipeline_mode = #tpu.pipeline_mode<synchronous>, transform_indices = @transform_3, window_bounds = array<i64: 32, 32>}, {pipeline_mode = #tpu.pipeline_mode<synchronous>, transform_indices = @transform_4, window_bounds = array<i64: 32, 1>}, {pipeline_mode = #tpu.pipeline_mode<synchronous>, transform_indices = @transform_5, window_bounds = array<i64: 32, 32>}, {pipeline_mode = #tpu.pipeline_mode<synchronous>, transform_indices = @transform_6, window_bounds = array<i64: 32, 32>}, {pipeline_mode = #tpu.pipeline_mode<synchronous>, transform_indices = @transform_7, window_bounds = array<i64: 32, 1>}, {pipeline_mode = #tpu.pipeline_mode<synchronous>, transform_indices = @transform_8, window_bounds = array<i64: 32, 32>}, {pipeline_mode = #tpu.pipeline_mode<synchronous>, transform_indices = @transform_9, window_bounds = array<i64: 32, 1>}, {transform_indices = @transform_10, window_bounds = array<i64: 32, 128>}]} {
    %c0 = arith.constant 0 : index
    %c0_0 = arith.constant 0 : index
    %0 = vector.load %arg1[%c0, %c0_0] : memref<32x128xbf16, #tpu.memory_space<vmem>>, vector<32x128xbf16>
    %c0_1 = arith.constant 0 : index
    %c0_2 = arith.constant 0 : index
    %1 = vector.load %arg2[%c0_1, %c0_2] : memref<32x32xbf16, #tpu.memory_space<vmem>>, vector<32x32xbf16>
    %cst = arith.constant dense<0.000000e+00> : vector<32x128xf32>
    %2 = tpu.matmul %1, %0, %cst {dimension_numbers = #tpu.dot_dimension_numbers<[1], [0], [0], [1], [0, 0, 1, 1], [], []>} : vector<32x32xbf16>, vector<32x128xbf16>, vector<32x128xf32> -> vector<32x128xf32>
    %c0_3 = arith.constant 0 : index
    %c0_4 = arith.constant 0 : index
    %3 = vector.load %arg3[%c0_3, %c0_4] : memref<32x1xf32, #tpu.memory_space<vmem>>, vector<32x1xf32>
    %4 = vector.broadcast %3 : vector<32x1xf32> to vector<32x128xf32>
    %5 = arith.addf %2, %4 : vector<32x128xf32>
    %cst_5 = arith.constant 0.000000e+00 : f32
    %6 = vector.broadcast %cst_5 : f32 to vector<32x128xf32>
    %7 = arith.maximumf %5, %6 : vector<32x128xf32>
    %c0_6 = arith.constant 0 : index
    %c0_7 = arith.constant 0 : index
    %8 = vector.load %arg4[%c0_6, %c0_7] : memref<32x32xbf16, #tpu.memory_space<vmem>>, vector<32x32xbf16>
    %9 = arith.truncf %7 : vector<32x128xf32> to vector<32x128xbf16>
    %cst_8 = arith.constant dense<0.000000e+00> : vector<32x128xf32>
    %10 = tpu.matmul %8, %9, %cst_8 {dimension_numbers = #tpu.dot_dimension_numbers<[1], [0], [0], [1], [0, 0, 1, 1], [], []>} : vector<32x32xbf16>, vector<32x128xbf16>, vector<32x128xf32> -> vector<32x128xf32>
    %c0_9 = arith.constant 0 : index
    %c0_10 = arith.constant 0 : index
    %11 = vector.load %arg5[%c0_9, %c0_10] : memref<32x1xf32, #tpu.memory_space<vmem>>, vector<32x1xf32>
    %12 = vector.broadcast %11 : vector<32x1xf32> to vector<32x128xf32>
    %13 = arith.addf %10, %12 : vector<32x128xf32>
    %cst_11 = arith.constant 0.000000e+00 : f32
    %14 = vector.broadcast %cst_11 : f32 to vector<32x128xf32>
    %15 = arith.maximumf %13, %14 : vector<32x128xf32>
    %c0_12 = arith.constant 0 : index
    %c0_13 = arith.constant 0 : index
    %16 = vector.load %arg6[%c0_12, %c0_13] : memref<32x32xbf16, #tpu.memory_space<vmem>>, vector<32x32xbf16>
    %17 = arith.truncf %15 : vector<32x128xf32> to vector<32x128xbf16>
    %cst_14 = arith.constant dense<0.000000e+00> : vector<32x128xf32>
    %18 = tpu.matmul %16, %17, %cst_14 {dimension_numbers = #tpu.dot_dimension_numbers<[1], [0], [0], [1], [0, 0, 1, 1], [], []>} : vector<32x32xbf16>, vector<32x128xbf16>, vector<32x128xf32> -> vector<32x128xf32>
    %c0_15 = arith.constant 0 : index
    %c0_16 = arith.constant 0 : index
    %19 = vector.load %arg7[%c0_15, %c0_16] : memref<32x32xbf16, #tpu.memory_space<vmem>>, vector<32x32xbf16>
    %cst_17 = arith.constant dense<0.000000e+00> : vector<32x128xf32>
    %20 = tpu.matmul %19, %0, %cst_17 {dimension_numbers = #tpu.dot_dimension_numbers<[1], [0], [0], [1], [0, 0, 1, 1], [], []>} : vector<32x32xbf16>, vector<32x128xbf16>, vector<32x128xf32> -> vector<32x128xf32>
    %21 = arith.addf %18, %20 : vector<32x128xf32>
    %c0_18 = arith.constant 0 : index
    %c0_19 = arith.constant 0 : index
    %22 = vector.load %arg8[%c0_18, %c0_19] : memref<32x1xf32, #tpu.memory_space<vmem>>, vector<32x1xf32>
    %23 = vector.broadcast %22 : vector<32x1xf32> to vector<32x128xf32>
    %24 = arith.addf %21, %23 : vector<32x128xf32>
    %cst_20 = arith.constant 0.000000e+00 : f32
    %25 = vector.broadcast %cst_20 : f32 to vector<32x128xf32>
    %26 = arith.maximumf %24, %25 : vector<32x128xf32>
    %c0_21 = arith.constant 0 : index
    %c0_22 = arith.constant 0 : index
    %27 = vector.load %arg9[%c0_21, %c0_22] : memref<32x32xbf16, #tpu.memory_space<vmem>>, vector<32x32xbf16>
    %28 = arith.truncf %26 : vector<32x128xf32> to vector<32x128xbf16>
    %cst_23 = arith.constant dense<0.000000e+00> : vector<32x128xf32>
    %29 = tpu.matmul %27, %28, %cst_23 {dimension_numbers = #tpu.dot_dimension_numbers<[1], [0], [0], [1], [0, 0, 1, 1], [], []>} : vector<32x32xbf16>, vector<32x128xbf16>, vector<32x128xf32> -> vector<32x128xf32>
    %c0_24 = arith.constant 0 : index
    %c0_25 = arith.constant 0 : index
    %30 = vector.load %arg10[%c0_24, %c0_25] : memref<32x1xf32, #tpu.memory_space<vmem>>, vector<32x1xf32>
    %31 = vector.broadcast %30 : vector<32x1xf32> to vector<32x128xf32>
    %32 = arith.addf %29, %31 : vector<32x128xf32>
    %cst_26 = arith.constant 0.000000e+00 : f32
    %33 = vector.broadcast %cst_26 : f32 to vector<32x128xf32>
    %34 = arith.maximumf %32, %33 : vector<32x128xf32>
    %c0_27 = arith.constant 0 : index
    %c0_28 = arith.constant 0 : index
    %35 = vector.load %arg11[%c0_27, %c0_28] : memref<32x128xf32, #tpu.memory_space<vmem>>, vector<32x128xf32>
    tpu.vector_store %arg11[%c0_27, %c0_28], %34 {strides = array<i32>} : memref<32x128xf32, #tpu.memory_space<vmem>>, vector<32x128xf32>,
    return
  }
  func.func @transform_0(%arg0: i32) -> (i32, i32) {
    %c0_i32 = arith.constant 0 : i32
    %c0_i32_0 = arith.constant 0 : i32
    return %c0_i32, %arg0 : i32, i32
  }
  func.func @transform_1(%arg0: i32) -> (i32, i32) {
    %c0_i32 = arith.constant 0 : i32
    %c0_i32_0 = arith.constant 0 : i32
    %c0_i32_1 = arith.constant 0 : i32
    return %c0_i32, %c0_i32_0 : i32, i32
  }
  func.func @transform_2(%arg0: i32) -> (i32, i32) {
    %c0_i32 = arith.constant 0 : i32
    %c0_i32_0 = arith.constant 0 : i32
    %c0_i32_1 = arith.constant 0 : i32
    return %c0_i32, %c0_i32_0 : i32, i32
  }
  func.func @transform_3(%arg0: i32) -> (i32, i32) {
    %c0_i32 = arith.constant 0 : i32
    %c0_i32_0 = arith.constant 0 : i32
    %c0_i32_1 = arith.constant 0 : i32
    return %c0_i32, %c0_i32_0 : i32, i32
  }
  func.func @transform_4(%arg0: i32) -> (i32, i32) {
    %c0_i32 = arith.constant 0 : i32
    %c0_i32_0 = arith.constant 0 : i32
    %c0_i32_1 = arith.constant 0 : i32
    return %c0_i32, %c0_i32_0 : i32, i32
  }
  func.func @transform_5(%arg0: i32) -> (i32, i32) {
    %c0_i32 = arith.constant 0 : i32
    %c0_i32_0 = arith.constant 0 : i32
    %c0_i32_1 = arith.constant 0 : i32
    return %c0_i32, %c0_i32_0 : i32, i32
  }
  func.func @transform_6(%arg0: i32) -> (i32, i32) {
    %c0_i32 = arith.constant 0 : i32
    %c0_i32_0 = arith.constant 0 : i32
    %c0_i32_1 = arith.constant 0 : i32
    return %c0_i32, %c0_i32_0 : i32, i32
  }
  func.func @transform_7(%arg0: i32) -> (i32, i32) {
    %c0_i32 = arith.constant 0 : i32
    %c0_i32_0 = arith.constant 0 : i32
    %c0_i32_1 = arith.constant 0 : i32
    return %c0_i32, %c0_i32_0 : i32, i32
  }
  func.func @transform_8(%arg0: i32) -> (i32, i32) {
    %c0_i32 = arith.constant 0 : i32
    %c0_i32_0 = arith.constant 0 : i32
    %c0_i32_1 = arith.constant 0 : i32
    return %c0_i32, %c0_i32_0 : i32, i32
  }
  func.func @transform_9(%arg0: i32) -> (i32, i32) {
    %c0_i32 = arith.constant 0 : i32
    %c0_i32_0 = arith.constant 0 : i32
    %c0_i32_1 = arith.constant 0 : i32
    return %c0_i32, %c0_i32_0 : i32, i32
  }
  func.func @transform_10(%arg0: i32) -> (i32, i32) {
    %c0_i32 = arith.constant 0 : i32
    %c0_i32_0 = arith.constant 0 : i32
    return %c0_i32, %arg0 : i32, i32
  }
}

</mosaic_0001>

<bundles_post_ra>
// kernel: tpu_custom_call.1
= control target key start
LH: loop header
LB: loop body
LE: loop exit
PB: predicated region body
PF: predicated region fallthrough
CT: control target
= control target key end

     0   :  { %vm91_vm0 = vcmask 261120   ;;  %v669_v3 = vmov 0   ;;  %s834_s0 = inlined_call_operand.vmem [shape: bf16[32,128], index: 0, kind: input, shape index: {}]   ;;  %s835_s1 = inlined_call_operand.vmem [shape: bf16[32,32], index: 1, kind: input, shape index: {}]   ;;  %s836_s2 = inlined_call_operand.vmem [shape: f32[32,1], index: 2, kind: input, shape index: {}]   ;;  %s837_s3 = inlined_call_operand.vmem [shape: bf16[32,32], index: 3, kind: input, shape index: {}]   ;;  %s838_s4 = inlined_call_operand.vmem [shape: f32[32,1], index: 4, kind: input, shape index: {}]   ;;  %s839_s5 = inlined_call_operand.vmem [shape: bf16[32,32], index: 5, kind: input, shape index: {}]   ;;  %s840_s6 = inlined_call_operand.vmem [shape: bf16[32,32], index: 6, kind: input, shape index: {}]   ;;  %s841_s7 = inlined_call_operand.vmem [shape: f32[32,1], index: 7, kind: input, shape index: {}]   ;;  %s842_s8 = inlined_call_operand.vmem [shape: bf16[32,32], index: 8, kind: input, shape index: {}]   ;;  %s843_s9 = inlined_call_operand.vmem [shape: f32[32,1], index: 9, kind: input, shape index: {}]   ;;  %s844_s10 = inlined_call_operand.hbm [shape: f32[32,128], index: 10, kind: output, shape index: {}]  }
   0x1   :  { %v633_v0 = vld [vmem:[%s834_s0] sm:$0xff]   ;;  %v634_v1 = vld [vmem:[%s834_s0 + $0x8] sm:$0xff]   ;;  %631 = vset.pattern.permute.xlu0 %v669_v3  ;;  %632 = vset.pattern.permute.xlu1 %v669_v3  ;;  %v47_v5 = vld [vmem:[%s836_s2 + $0x10] sm:$0xff] }
   0x2   :  { %583 = vmatprep.subr.bf16.mxu0 %v633_v0  ;;  %v635_v2 = vld [vmem:[%s835_s1] sm:$0xff]   ;;  %61 = vperm.xlu1 %632, %v47_v5   ;;  %v636_v6 = vld [vmem:[%s835_s1 + $0x8] sm:$0xff]   ;;  %v48_v8 = vld [vmem:[%s836_s2 + $0x18] sm:$0xff] }
   0x3   :  { %584 = vmatpush3.bf16.msra.mxu0 %v633_v0  ;;  %587 = vmatprep.mubr.msk.bf16.mxu0 %vm91_vm0, %v635_v2  ;;  %v45_v4 = vld [vmem:[%s836_s2] sm:$0xff]  ;;  %v46_v7 = vld [vmem:[%s836_s2 + $0x8] sm:$0xff]  ;;  %v159_v11 = vld [vmem:[%s838_s4 + $0x10] sm:$0xff] }
   0x4   :  { %585 = vmatprep.subr.bf16.mxu0 %v634_v1  ;;  %51 = vperm.xlu0 %631, %v45_v4   ;;  %v157_v9 = vld [vmem:[%s838_s4] sm:$0xff]  ;;  %v158_v10 = vld [vmem:[%s838_s4 + $0x8] sm:$0xff]  ;;  %v160_v12 = vld [vmem:[%s838_s4 + $0x18] sm:$0xff] }
   0x6   :  { %66 = vperm.xlu1 %632, %v48_v8  }
   0x7   :  { %586 = vmatpush3.bf16.msra.mxu0 %v634_v1 }
   0x8   :  { %599 = vmatprep.subr.bf16.mxu0 %v633_v0  ;;  %56 = vperm.xlu0 %631, %v46_v7  }
   0xa   :  { %588 = vmatmul.mubr.msk.bf16.vlgmr.msra.gmra.mrb[0].mxu0 %vm91_vm0, %v636_v6  ;;  %168 = vperm.xlu1 %632, %v158_v10  }
   0xb   :  { %600 = vmatpush3.bf16.msra.mxu0 %v633_v0 }
   0xc   :  { %601 = vmatprep.subr.bf16.mxu0 %v634_v1  ;;  %163 = vperm.xlu0 %631, %v157_v9  }
   0xd   :  { %15 = vsyncpa [#allocation3], 0  ;;  %v390_v13 = vld [vmem:[%s841_s7] sm:$0xff]  ;;  %v391_v14 = vld [vmem:[%s841_s7 + $0x8] sm:$0xff]  ;;  %s670_s17 = smov [#allocation2]  }
   0xe   :  { %178 = vperm.xlu1 %632, %v160_v12   ;;  %v392_v15 = vld [vmem:[%s841_s7 + $0x10] sm:$0xff]  ;;  %v393_v16 = vld [vmem:[%s841_s7 + $0x18] sm:$0xff]  ;;  %v428_v17 = vld [vmem:[%s843_s9] sm:$0xff]  ;;  %s530_s18 = sshll.u32 %s670_s17, 4  ;;  %s531_s18 = int_to_ptr.vmem [resolvable:$true] %s530_s18 }
   0xf   :  { %602 = vmatpush3.bf16.msra.mxu0 %v634_v1  ;;  %v429_v18 = vld [vmem:[%s843_s9 + $0x8] sm:$0xff]  ;;  %v430_v19 = vld [vmem:[%s843_s9 + $0x10] sm:$0xff]  ;;  %v431_v20 = vld [vmem:[%s843_s9 + $0x18] sm:$0xff]  ;;  %p650_p1 = scmp.lt.s32.totalorder %s531_s18, %s531_s18 }
  0x10   :  { %173 = vperm.xlu0 %631, %v159_v11   ;;  %v637_v21 = vld [vmem:[%s837_s3] sm:$0xff]   ;;  %v638_v40 = vld [vmem:[%s837_s3 + $0x8] sm:$0xff]  }
  0x11   :  { %595 = vmatprep.mubr.msk.bf16.mxu1 %vm91_vm0, %v637_v21  ;;  %v639_v41 = vld [vmem:[%s840_s6] sm:$0xff]   ;;  %v640_v42 = vld [vmem:[%s840_s6 + $0x8] sm:$0xff]  }
  0x12   :  { %401 = vperm.xlu1 %632, %v391_v14   ;;  %603 = vmatprep.mubr.msk.bf16.mxu0 %vm91_vm0, %v639_v41  ;;  %v641_v43 = vld [vmem:[%s839_s5] sm:$0xff]   ;;  %v642_v62 = vld [vmem:[%s839_s5 + $0x8] sm:$0xff]  }
  0x13   :  { %604 = vmatmul.mubr.msk.bf16.vlgmr.msra.gmra.mrb[4].mxu0 %vm91_vm0, %v640_v42  ;;  %v643_v63 = vld [vmem:[%s842_s8] sm:$0xff]  }
  0x14   :  { %396 = vperm.xlu0 %631, %v390_v13   ;;  %611 = vmatprep.mubr.msk.bf16.mxu0 %vm91_vm0, %v641_v43 }
  0x16   :  { %411 = vperm.xlu1 %632, %v393_v16  }
  0x18   :  { %406 = vperm.xlu0 %631, %v392_v15  }
  0x1a   :  { %439 = vperm.xlu1 %632, %v429_v18   ;;  %v644_v18 = vld [vmem:[%s842_s8 + $0x8] sm:$0xff]   ;;  %s645_s8 = scalar_lea.vmem %s531_s18, 512 }
  0x1b   :  { %p646_p0 = scmp.ne.s32.totalorder %s531_s18, %s645_s8  ;;  %p651_p2 = scmp.lt.s32.totalorder %s645_s8, %s645_s8 }
  0x1c   :  { %434 = vperm.xlu0 %631, %v428_v17  }
  0x1d   :  { %p652_p3 = por %p651_p2, %p650_p1 }
  0x1e   :  { %449 = vperm.xlu1 %632, %v431_v20  }
  0x1f   :  { %p653_p4 = pnand %p652_p3, %p646_p0 }
  0x20   :  { %444 = vperm.xlu0 %631, %v430_v19  }
  0x81   :  { %v62_v22 = vpop.permute.xlu1 %61 }
  0x83   :  { %v52_v23 = vpop.permute.xlu0 %51 }
  0x85   :  { %v67_v27 = vpop.permute.xlu1 %66 }
  0x87   :  { %v57_v30 = vpop.permute.xlu0 %56 }
  0x89   :  { %v169_v45 = vpop.permute.xlu1 %168 }
  0x8b   :  { %v164_v44 = vpop.permute.xlu0 %163 }
  0x8d   :  { %v179_v50 = vpop.permute.xlu1 %178 }
  0x8f   :  { %v174_v46 = vpop.permute.xlu0 %173 }
  0x91   :  { %v402_v1 = vpop.permute.xlu1 %401 }
  0x93   :  { %v397_v0 = vpop.permute.xlu0 %396 }
  0x95   :  { %v412_v6 = vpop.permute.xlu1 %411 }
  0x97   :  { %v407_v2 = vpop.permute.xlu0 %406 }
  0x99   :  { %v440_v20 = vpop.permute.xlu1 %439 }
  0x9b   :  { %v435_v19 = vpop.permute.xlu0 %434 }
  0x9f   :  { %v445_v21 = vpop.permute.xlu0 %444 }
  0xdd   :  { %v589_v24 = vpop.f32.mrb[0].mxu0 }
  0xde   :  { %v141_v25 = vadd.f32 %v589_v24, %v62_v22  ;;  %v132_v26 = vpop.f32.mrb[1].mxu0 }
  0xdf   :  { %v133_v28 = vadd.f32 %v132_v26, %v52_v23  ;;  %v590_v29 = vpop.f32.mrb[2].mxu0 }
  0xe0   :  { %v144_v31 = vadd.f32 %v590_v29, %v67_v27  ;;  %v135_v32 = vpop.f32.mrb[3].mxu0  ;;  %v149_v34 = vmax.f32 %v141_v25, 0.0  ;;  %v450_v25 = vpop.permute.xlu1 %449 }
  0xe1   :  { %v136_v33 = vadd.f32 %v135_v32, %v57_v30  ;;  %v147_v36 = vmax.f32 %v133_v28, 0.0 }
  0xe2   :  { %v150_v35 = vmax.f32 %v144_v31, 0.0 }
  0xe3   :  { %v148_v37 = vmax.f32 %v136_v33, 0.0 }
  0xe4   :  { %v156_v38 = vpack.c.bf16 %v150_v35, %v149_v34 }
  0xe5   :  { %v155_v39 = vpack.c.bf16 %v148_v37, %v147_v36 }
  0xe7   :  { %591 = vmatprep.subr.bf16.mxu1 %v155_v39 }
  0xe8   :  { %592 = vmatpush3.bf16.msra.mxu1 %v155_v39 }
  0xe9   :  { %593 = vmatprep.subr.bf16.mxu1 %v156_v38 }
  0xec   :  { %594 = vmatpush3.bf16.msra.mxu1 %v156_v38 }
  0xef   :  { %596 = vmatmul.mubr.msk.bf16.vlgmr.msra.gmra.mrb[0].mxu1 %vm91_vm0, %v638_v40 }
  0xf0   :  { %619 = vmatprep.mubr.msk.bf16.mxu1 %vm91_vm0, %v643_v63 }
 0x1c2   :  { %v597_v47 = vpop.f32.mrb[0].mxu1 }
 0x1c3   :  { %v240_v48 = vadd.f32 %v597_v47, %v174_v46  ;;  %v231_v49 = vpop.f32.mrb[1].mxu1 }
 0x1c4   :  { %v232_v51 = vadd.f32 %v231_v49, %v164_v44  ;;  %v598_v52 = vpop.f32.mrb[2].mxu1 }
 0x1c5   :  { %v243_v53 = vadd.f32 %v598_v52, %v179_v50  ;;  %v234_v54 = vpop.f32.mrb[3].mxu1  ;;  %v248_v56 = vmax.f32 %v240_v48, 0.0 }
 0x1c6   :  { %v235_v55 = vadd.f32 %v234_v54, %v169_v45  ;;  %v246_v58 = vmax.f32 %v232_v51, 0.0 }
 0x1c7   :  { %v249_v57 = vmax.f32 %v243_v53, 0.0 }
 0x1c8   :  { %v247_v59 = vmax.f32 %v235_v55, 0.0 }
 0x1c9   :  { %v255_v60 = vpack.c.bf16 %v249_v57, %v248_v56 }
 0x1ca   :  { %v254_v61 = vpack.c.bf16 %v247_v59, %v246_v58 }
 0x1cc   :  { %607 = vmatprep.subr.bf16.mxu0 %v254_v61 }
 0x1cd   :  { %608 = vmatpush3.bf16.msra.mxu0 %v254_v61 }
 0x1ce   :  { %609 = vmatprep.subr.bf16.mxu0 %v255_v60 }
 0x1d1   :  { %610 = vmatpush3.bf16.msra.mxu0 %v255_v60 }
 0x1d4   :  { %612 = vmatmul.mubr.msk.bf16.vlgmr.msra.gmra.mrb[4].mxu0 %vm91_vm0, %v642_v62 }
 0x2a7   :  { %v613_v3 = vpop.f32.mrb[4].mxu0 }
 0x2a8   :  { %v416_v4 = vadd.f32 %v613_v3, %v407_v2  ;;  %v375_v5 = vpop.f32.mrb[5].mxu0 }
 0x2a9   :  { %v414_v7 = vadd.f32 %v397_v0, %v375_v5  ;;  %v614_v8 = vpop.f32.mrb[6].mxu0 }
 0x2aa   :  { %v417_v9 = vadd.f32 %v614_v8, %v412_v6  ;;  %v378_v10 = vpop.f32.mrb[7].mxu0  ;;  %v420_v12 = vmax.f32 %v416_v4, 0.0 }
 0x2ab   :  { %v415_v11 = vadd.f32 %v402_v1, %v378_v10  ;;  %v418_v14 = vmax.f32 %v414_v7, 0.0 }
 0x2ac   :  { %v421_v13 = vmax.f32 %v417_v9, 0.0 }
 0x2ad   :  { %v419_v15 = vmax.f32 %v415_v11, 0.0 }
 0x2ae   :  { %v427_v16 = vpack.c.bf16 %v421_v13, %v420_v12 }
 0x2af   :  { %v426_v17 = vpack.c.bf16 %v419_v15, %v418_v14 }
 0x2b1   :  { %615 = vmatprep.subr.bf16.mxu1 %v426_v17 }
 0x2b2   :  { %616 = vmatpush3.bf16.msra.mxu1 %v426_v17 }
 0x2b3   :  { %617 = vmatprep.subr.bf16.mxu1 %v427_v16 }
 0x2b6   :  { %618 = vmatpush3.bf16.msra.mxu1 %v427_v16 }
 0x2b9   :  { %620 = vmatmul.mubr.msk.bf16.vlgmr.msra.gmra.mrb[4].mxu1 %vm91_vm0, %v644_v18 }
 0x38c   :  { %v621_v22 = vpop.f32.mrb[4].mxu1 }
 0x38d   :  { %v511_v23 = vadd.f32 %v621_v22, %v445_v21  ;;  %v502_v24 = vpop.f32.mrb[5].mxu1 }
 0x38e   :  { %v503_v26 = vadd.f32 %v502_v24, %v435_v19  ;;  %v622_v27 = vpop.f32.mrb[6].mxu1 }
 0x38f   :  { %v519_v28 = vmax.f32 %v511_v23, 0.0  ;;  %v514_v29 = vadd.f32 %v622_v27, %v450_v25  ;;  %v505_v30 = vpop.f32.mrb[7].mxu1 }
 0x390   :  { %v517_v31 = vmax.f32 %v503_v26, 0.0  ;;  %v506_v32 = vadd.f32 %v505_v30, %v440_v20 }
 0x391   :  { %523 = vst [vmem:[#allocation2 + $0x10] sm:$0xff] %v519_v28  ;;  %v520_v33 = vmax.f32 %v514_v29, 0.0 }
 0x392   :  { %521 = vst [vmem:[#allocation2] sm:$0xff] %v517_v31  ;;  %v518_v34 = vmax.f32 %v506_v32, 0.0 }
 0x393   :  { %524 = vst [vmem:[#allocation2 + $0x18] sm:$0xff] %v520_v33 }
 0x394   :  { %522 = vst [vmem:[#allocation2 + $0x8] sm:$0xff] %v518_v34 }
 0x395   :  { %656 = shalt.err (!%p653_p4)
}
 0x396   :  { %s657_s20 = scalar_lea.hbm %s844_s10, 512 }
 0x397   :  { %p658_p5 = scmp.ne.s32.totalorder %s844_s10, %s657_s20  ;;  %p661_p6 = scmp.lt.u32.totalorder %s657_s20, %s844_s10 }
 0x399   :  { %p663_p7 = pnand %p661_p6, %p658_p5 }
 0x39b   :  { %666 = shalt.err (!%p663_p7)
}
 0x39c   :  { %s671_s24 = smov 128   ;;  %s672_s25 = smov 8  }
 0x39d   :  { %536 = dma.vmem_to_hbm [thread:$0]  %s531_s18, 512, %s844_s10, [#allocation3], %s671_s24, %s671_s24, %s672_s25  }
 0x39e   :  { %667 = dma.done.wait [#allocation3], 512  }
 0x39f   :  { %668 = vsyncadd [#allocation3], 4294966784 }
 0x3a0   :  { %540 = vsyncpa [#allocation3], 1 }

</bundles_post_ra>
